<compile_context>
chip_gen: v7x
topology: tpu7x:2x2x1
jax: 0.10.0
libtpu: 0.0.40
codegen_flags: <defaults>
</compile_context>

<pallas_src>
import functools
import random

import jax
import jax.numpy as jnp
from jax.experimental import pallas as pl
from jax.experimental.pallas import tpu as pltpu


# --------------------------------------------------------------------------- #
# Kernel bodies
# --------------------------------------------------------------------------- #
def _onehot_argmax(z):
    """one_hot(argmax(z, -1)) with first-index tie-breaking (bool result)."""
    D = z.shape[-1]
    iota = jax.lax.broadcasted_iota(jnp.int32, z.shape, z.ndim - 1)
    zmax = jnp.max(z, axis=-1, keepdims=True)
    idx = jnp.min(jnp.where(z == zmax, iota, D), axis=-1, keepdims=True)
    return iota == idx


def _gumbel_hard_kernel(x_ref, g_ref, o_ref):
    # hard straight-through forward value == one_hot(argmax(x + g)); the
    # softmax / tau scaling is argmax-invariant, so skip all transcendentals.
    z = x_ref[...].astype(jnp.float32) + g_ref[...]
    o_ref[...] = _onehot_argmax(z).astype(o_ref.dtype)


def _gumbel_soft_kernel(x_ref, g_ref, o_ref, *, inv_tau):
    z = (x_ref[...].astype(jnp.float32) + g_ref[...]) * inv_tau
    m = jnp.max(z, axis=-1, keepdims=True)
    e = jnp.exp(z - m)
    inv = 1.0 / jnp.sum(e, axis=-1, keepdims=True)  # one divide per row
    o_ref[...] = (e * inv).astype(o_ref.dtype)      # per-element multiply (VALU)


def _argmax_onehot_kernel(x_ref, o_ref):
    # argmax(softmax(x)) == argmax(x): drop the softmax entirely.
    o_ref[...] = _onehot_argmax(x_ref[...].astype(jnp.float32)).astype(o_ref.dtype)


# --------------------------------------------------------------------------- #
# Tiling helpers
# --------------------------------------------------------------------------- #
_TARGET_BLOCK_BYTES = 1 << 20   # ~1 MiB (f32) per stream per block
_MAX_ROW_TILE = 2048


def _pick_row_tile(R, D):
    """Largest multiple-of-8 row tile within the VMEM budget (safe on v5e/v6e/v7x)."""
    rows = (_TARGET_BLOCK_BYTES // (D * 4)) // 8 * 8
    rows = max(8, min(rows, _MAX_ROW_TILE))
    r_pad8 = -(-R // 8) * 8
    return min(rows, r_pad8)


def _pad_rows(x2, R_pad):
    R = x2.shape[0]
    if R_pad == R:
        return x2
    return jnp.pad(x2, ((0, R_pad - R), (0, 0)))


# --------------------------------------------------------------------------- #
# Module wrapper
# --------------------------------------------------------------------------- #
class GumbelSoftmax:
    """Pallas/TPU port of the PyTorch GumbelSoftmax forward pass."""

    def __init__(self, tau: float = 1.0, hard_p: float = 1.0, training: bool = True,
                 seed: int = 0):
        self._tau = float(tau)
        self._hard_p = float(hard_p)
        self.training = training
        self._host_rng = random.Random(seed)   # mirrors torch.rand(1).item() gate
        self._key = jax.random.PRNGKey(seed)

    def _hard(self) -> bool:
        return self._host_rng.random() < self._hard_p

    def _next_key(self):
        self._key, sub = jax.random.split(self._key)
        return sub

    def __call__(self, x, hard: bool = True):
        D = x.shape[-1]
        R = int(x.size) // D
        x2 = x.reshape(R, D)                      # keep native dtype (no f32 upcast)

        row_tile = _pick_row_tile(R, D)
        R_pad = -(-R // row_tile) * row_tile
        grid = (R_pad // row_tile,)
        x2p = _pad_rows(x2, R_pad)

        spec = pl.BlockSpec((row_tile, D), lambda i: (i, 0))
        cparams = pltpu.CompilerParams(dimension_semantics=("parallel",))

        if self.training:
            # fresh Gumbel noise every call (matches torch sampling per call)
            g = jax.random.gumbel(self._next_key(), (R_pad, D), dtype=jnp.float32)
            hard_flag = bool(hard and self._hard())
            out_dtype = x.dtype
            if hard_flag:
                kernel = _gumbel_hard_kernel
            else:
                kernel = functools.partial(_gumbel_soft_kernel,
                                           inv_tau=1.0 / self._tau)
            fn = pl.pallas_call(
                kernel,
                out_shape=jax.ShapeDtypeStruct((R_pad, D), out_dtype),
                grid=grid,
                in_specs=[spec, spec],
                out_specs=spec,
                compiler_params=cparams,
            )
            out = fn(x2p, g)
        else:
            fn = pl.pallas_call(
                _argmax_onehot_kernel,
                out_shape=jax.ShapeDtypeStruct((R_pad, D), jnp.float32),
                grid=grid,
                in_specs=[spec],
                out_specs=spec,
                compiler_params=cparams,
            )
            out = fn(x2p)

        return out[:R].reshape(x.shape if self.training else x.shape)


# --------------------------------------------------------------------------- #
# Self-test
# --------------------------------------------------------------------------- #
if __name__ == "__main__":
    key = jax.random.PRNGKey(0)
    # (batch=2, seq=8, hidden=128); softmax over last dim.
    x = jax.random.normal(key, (2, 8, 128), dtype=jnp.float32)

    # --- inference path: one_hot(argmax(softmax(x, -1))) --------------------
    gs_eval = GumbelSoftmax(tau=1.0, hard_p=1.0, training=False)
    y_eval = jax.block_until_ready(gs_eval(x))
    assert y_eval.shape == x.shape and y_eval.dtype == jnp.float32
    assert jnp.allclose(jnp.sum(y_eval, axis=-1), 1.0)
    assert jnp.array_equal(jnp.argmax(y_eval, axis=-1), jnp.argmax(x, axis=-1))

    # --- training path: hard gumbel-softmax (straight-through forward) ------
    gs_train = GumbelSoftmax(tau=1.0, hard_p=1.0, training=True, seed=0)
    y_hard = jax.block_until_ready(gs_train(x, hard=True))
    assert y_hard.shape == x.shape and y_hard.dtype == x.dtype
    assert jnp.array_equal(jnp.sum(y_hard, axis=-1), jnp.ones(x.shape[:-1]))
    assert jnp.array_equal(jnp.max(y_hard, axis=-1), jnp.ones(x.shape[:-1]))

    # --- training path: soft gumbel-softmax ----------------------------------
    y_soft = jax.block_until_ready(gs_train(x, hard=False))
    assert y_soft.shape == x.shape and y_soft.dtype == x.dtype
    assert jnp.allclose(jnp.sum(y_soft, axis=-1), 1.0, atol=1e-5)
    assert jnp.all(y_soft >= 0.0)

    # --- bf16 pass-through (no wrapper upcast; output in input dtype) --------
    xb = x.astype(jnp.bfloat16)
    yb = jax.block_until_ready(gs_train(xb, hard=False))
    assert yb.dtype == jnp.bfloat16 and yb.shape == xb.shape

    # --- ragged row count (R not a multiple of 8) -----------------------------
    xr = jax.random.normal(jax.random.PRNGKey(1), (3, 5, 128), dtype=jnp.float32)
    yr = jax.block_until_ready(GumbelSoftmax(training=False)(xr))
    assert jnp.array_equal(jnp.argmax(yr, axis=-1), jnp.argmax(xr, axis=-1))

    print("KERNEL_OK")
</pallas_src>

<mosaic_0001>
module attributes {stable_mosaic.version = 11 : i64} {
  func.func @_argmax_onehot_kernel(%arg0: i32, %arg1: memref<16x128xf32, #tpu.memory_space<vmem>>, %arg2: memref<16x128xf32, #tpu.memory_space<vmem>>) attributes {dimension_semantics = [#tpu.dimension_semantics<parallel>], iteration_bounds = array<i64: 1>, scalar_prefetch = 0 : i64, scratch_operands = 0 : i64, tpu.core_type = #tpu.core_type<tc>, window_params = [{transform_indices = @transform_0, window_bounds = array<i64: 16, 128>}, {transform_indices = @transform_1, window_bounds = array<i64: 16, 128>}]} {
    %c0 = arith.constant 0 : index
    %c0_0 = arith.constant 0 : index
    %0 = vector.load %arg1[%c0, %c0_0] : memref<16x128xf32, #tpu.memory_space<vmem>>, vector<16x128xf32>
    %1 = tpu.iota {dimensions = array<i32: 1>} : vector<16x128xi32>
    %cst = arith.constant dense<0xFF800000> : vector<16xf32>
    %2 = vector.multi_reduction <maximumf>, %0, %cst [1] : vector<16x128xf32> to vector<16xf32>
    %3 = vector.shape_cast %2 : vector<16xf32> to vector<16x1xf32>
    %4 = vector.broadcast %3 : vector<16x1xf32> to vector<16x128xf32>
    %5 = arith.cmpf oeq, %0, %4 : vector<16x128xf32>
    %c128_i32 = arith.constant 128 : i32
    %6 = vector.broadcast %c128_i32 : i32 to vector<16x128xi32>
    %7 = arith.select %5, %1, %6 : vector<16x128xi1>, vector<16x128xi32>
    %cst_1 = arith.constant dense<2147483647> : vector<16xi32>
    %8 = vector.multi_reduction <minsi>, %7, %cst_1 [1] : vector<16x128xi32> to vector<16xi32>
    %9 = vector.shape_cast %8 : vector<16xi32> to vector<16x1xi32>
    %10 = vector.broadcast %9 : vector<16x1xi32> to vector<16x128xi32>
    %11 = arith.cmpi eq, %1, %10 : vector<16x128xi32>
    %12 = arith.extui %11 : vector<16x128xi1> to vector<16x128xi32>
    %13 = arith.sitofp %12 : vector<16x128xi32> to vector<16x128xf32>
    %c0_2 = arith.constant 0 : index
    %c0_3 = arith.constant 0 : index
    %14 = vector.load %arg2[%c0_2, %c0_3] : memref<16x128xf32, #tpu.memory_space<vmem>>, vector<16x128xf32>
    tpu.vector_store %arg2[%c0_2, %c0_3], %13 {strides = array<i32>} : memref<16x128xf32, #tpu.memory_space<vmem>>, vector<16x128xf32>,
    return
  }
  func.func @transform_0(%arg0: i32) -> (i32, i32) {
    %c0_i32 = arith.constant 0 : i32
    %c0_i32_0 = arith.constant 0 : i32
    return %arg0, %c0_i32 : i32, i32
  }
  func.func @transform_1(%arg0: i32) -> (i32, i32) {
    %c0_i32 = arith.constant 0 : i32
    %c0_i32_0 = arith.constant 0 : i32
    return %arg0, %c0_i32 : i32, i32
  }
}

</mosaic_0001>

<bundles_post_ra>
// kernel: tpu_custom_call.1
= control target key start
LH: loop header
LB: loop body
LE: loop exit
PB: predicated region body
PF: predicated region fallthrough
CT: control target
= control target key end

     0   :  { %6 = vsyncpa [#allocation3], 0  ;;  %s188_s0 = inlined_call_operand.hbm [shape: f32[16,128], index: 0, kind: input, shape index: {}]   ;;  %s189_s1 = inlined_call_operand.hbm [shape: f32[16,128], index: 1, kind: output, shape index: {}]  }
   0x1   :  { %7 = vsyncpa [#allocation4], 0  ;;  %s143_s6 = smov [#allocation2]   ;;  %s95_s10 = scalar_lea.hbm %s188_s0, 256 }
   0x2   :  { %s13_s7 = sshll.u32 %s143_s6, 4  ;;  %p96_p0 = scmp.ne.s32.totalorder %s188_s0, %s95_s10  ;;  %s14_s7 = int_to_ptr.vmem [resolvable:$true] %s13_s7 }
   0x3   :  { %p99_p1 = scmp.lt.u32.totalorder %s95_s10, %s188_s0 }
   0x5   :  { %p101_p2 = pnand %p99_p1, %p96_p0 }
   0x7   :  { %104 = shalt.err (!%p101_p2)
}
   0x8   :  { %s105_s15 = scalar_lea.vmem %s14_s7, 256  ;;  %p110_p4 = scmp.lt.s32.totalorder %s14_s7, %s14_s7 }
   0x9   :  { %p106_p3 = scmp.ne.s32.totalorder %s14_s7, %s105_s15  ;;  %p111_p5 = scmp.lt.s32.totalorder %s105_s15, %s105_s15 }
   0xb   :  { %p112_p6 = por %p111_p5, %p110_p4 }
   0xd   :  { %p113_p7 = pnand %p112_p6, %p106_p3 }
   0xf   :  { %116 = shalt.err (!%p113_p7)
}
  0x10   :  { %s144_s16 = smov 128   ;;  %s145_s17 = smov 8  }
  0x11   :  { %19 = dma.hbm_to_vmem [thread:$0]  %s188_s0, 256, %s14_s7, [#allocation3], %s144_s16, %s144_s16, %s145_s17  }
  0x12   :  { %139 = dma.done.wait [#allocation3], 256  }
  0x13   :  { %140 = vsyncadd [#allocation3], 4294967040  ;;  %v23_v0 = vld [vmem:[#allocation2] sm:$0xff]  ;;  %v24_v1 = vld [vmem:[#allocation2 + $0x8] sm:$0xff]  ;;  %v25_v2 = vlaneseq  ;;  %v146_v29 = vmov 0.0   ;;  %s147_s0 = smov [#allocation5]  }
  0x14   :  { %27 = vmax.xlane.f32.xlu0 %v23_v0  ;;  %s76_s20 = sshll.u32 %s147_s0, 4  ;;  %s77_s20 = int_to_ptr.vmem [resolvable:$true] %s76_s20 }
  0x15   :  { %v26_v3 = vand.u32 127, %v25_v2  ;;  %s117_s21 = scalar_lea.vmem %s77_s20, 256  ;;  %p122_p9 = scmp.lt.s32.totalorder %s77_s20, %s77_s20 }
  0x16   :  { %p118_p8 = scmp.ne.s32.totalorder %s77_s20, %s117_s21  ;;  %p123_p10 = scmp.lt.s32.totalorder %s117_s21, %s117_s21 }
  0x18   :  { %29 = vmax.xlane.f32.xlu0 %v24_v1  ;;  %p124_p11 = por %p123_p10, %p122_p9 }
  0x1a   :  { %p125_p12 = pnand %p124_p11, %p118_p8 }
  0xa1   :  { %v28_v4 = vpop.xlane.xlu0 %27 }
  0xa2   :  { %vm31_vm0 = vcmp.eq.f32.partialorder %v23_v0, %v28_v4 }
  0xa3   :  { %v33_v5 = vsel %vm31_vm0, %v26_v3, 128 }
  0xa4   :  { %v36_v6 = vshra.s32 %v33_v5, 16  ;;  %v35_v12 = vand.u32 65535, %v33_v5 }
  0xa5   :  { %v30_v7 = vpop.xlane.xlu0 %29 }
  0xa6   :  { %vm32_vm1 = vcmp.eq.f32.partialorder %v24_v1, %v30_v7  ;;  %v38_v8 = vcvt.s32.f32 %v36_v6  ;;  %v37_v15 = vcvt.s32.f32 %v35_v12 }
  0xa7   :  { %v34_v9 = vsel %vm32_vm1, %v26_v3, 128 }
  0xa8   :  { %39 = vmin.xlane.f32.xlu1 %v38_v8  ;;  %v50_v10 = vshra.s32 %v34_v9, 16  ;;  %v49_v13 = vand.u32 65535, %v34_v9 }
  0xaa   :  { %v52_v11 = vcvt.s32.f32 %v50_v10  ;;  %v51_v18 = vcvt.s32.f32 %v49_v13 }
  0xac   :  { %53 = vmin.xlane.f32.xlu1 %v52_v11 }
 0x135   :  { %v40_v14 = vpop.xlane.xlu1 %39 }
 0x136   :  { %vm41_vm2 = vcmp.eq.f32.partialorder %v38_v8, %v40_v14  ;;  %v46_v20 = vcvt.f32.s32 %v40_v14 }
 0x137   :  { %v42_v16 = vsel %vm41_vm2, %v37_v15, inf }
 0x138   :  { %43 = vmin.xlane.f32.xlu0 %v42_v16  ;;  %v47_v22 = vshll.u32 %v46_v20, 16 }
 0x139   :  { %v54_v17 = vpop.xlane.xlu1 %53 }
 0x13a   :  { %vm55_vm3 = vcmp.eq.f32.partialorder %v52_v11, %v54_v17  ;;  %v60_v23 = vcvt.f32.s32 %v54_v17 }
 0x13b   :  { %v56_v19 = vsel %vm55_vm3, %v51_v18, inf }
 0x13c   :  { %57 = vmin.xlane.f32.xlu1 %v56_v19  ;;  %v61_v27 = vshll.u32 %v60_v23, 16 }
 0x1c5   :  { %v44_v21 = vpop.xlane.xlu0 %43 }
 0x1c6   :  { %v45_v24 = vcvt.f32.s32 %v44_v21 }
 0x1c8   :  { %v48_v25 = vadd.s32 %v47_v22, %v45_v24 }
 0x1c9   :  { %v58_v26 = vpop.xlane.xlu1 %57 }
 0x1ca   :  { %vm63_vm4 = vcmp.eq.s32.totalorder %v26_v3, %v48_v25  ;;  %v59_v28 = vcvt.f32.s32 %v58_v26 }
 0x1cb   :  { %v88_v30 = vsel %vm63_vm4, 1.0, %v146_v29 }
 0x1cc   :  { %v62_v31 = vadd.s32 %v61_v27, %v59_v28  ;;  %69 = vst [vmem:[#allocation5] sm:$0xff] %v88_v30 }
 0x1ce   :  { %vm64_vm5 = vcmp.eq.s32.totalorder %v26_v3, %v62_v31 }
 0x1cf   :  { %v89_v32 = vsel %vm64_vm5, 1.0, %v146_v29 }
 0x1d0   :  { %70 = vst [vmem:[#allocation5 + $0x8] sm:$0xff] %v89_v32 }
 0x1d1   :  { %128 = shalt.err (!%p125_p12)
}
 0x1d2   :  { %s129_s24 = scalar_lea.hbm %s189_s1, 256 }
 0x1d3   :  { %p130_p13 = scmp.ne.s32.totalorder %s189_s1, %s129_s24  ;;  %p133_p0 = scmp.lt.u32.totalorder %s129_s24, %s189_s1 }
 0x1d5   :  { %p135_p1 = pnand %p133_p0, %p130_p13 }
 0x1d7   :  { %138 = shalt.err (!%p135_p1)
}
 0x1d8   :  { %82 = dma.vmem_to_hbm [thread:$0]  %s77_s20, 256, %s189_s1, [#allocation4], %s144_s16, %s144_s16, %s145_s17  }
 0x1d9   :  { %141 = dma.done.wait [#allocation4], 256  }
 0x1da   :  { %142 = vsyncadd [#allocation4], 4294967040 }
 0x1db   :  { %86 = vsyncpa [#allocation3], 1 }
 0x1dc   :  { %87 = vsyncpa [#allocation4], 1 }

</bundles_post_ra>
